<compile_context>
chip_gen: v5e
topology: v5e:2x2
jax: 0.10.0
libtpu: 0.0.40
codegen_flags: <defaults>
</compile_context>

<pallas_src>
import functools

import jax
import jax.numpy as jnp
import numpy as np
from jax.experimental import pallas as pl
from jax.experimental.pallas import tpu as pltpu


# --------------------------------------------------------------------------- #
# Fused Pallas kernel: one grid step == one batch element.
# All operands are in "transposed" layout: (channels, M) with M = Ho*Wo lanes.
# --------------------------------------------------------------------------- #
def _fused_kernel(x_ref, pool_ref, w1_ref, b1_ref, w2_ref, b2_ref,
                  wt_ref, bt_ref, wf_ref, bf_ref, o_ref, *, M, Wo, dot_dtype):
    f32 = jnp.float32
    xT = x_ref[0]                                              # (16C, M)

    # ---- down = avg_pool2d(x, 4, 4)  ->  (C, M) -----------------------------
    downT = jnp.dot(pool_ref[...], xT, preferred_element_type=f32)

    # ---- paramdown = relu(down2(relu(down1(x)))): two wide dots -------------
    h1 = jnp.maximum(
        jnp.dot(w1_ref[...], xT, preferred_element_type=f32) + b1_ref[...], 0.0)
    h2 = jnp.maximum(
        jnp.dot(w2_ref[...], h1.astype(dot_dtype),
                preferred_element_type=f32) + b2_ref[...], 0.0)   # (C, M) f32

    # ---- column-validity masks for the 3x3 taps (in-kernel, no HBM input) ---
    # j = r mod Wo via exact float math (avoids relying on vector int div/rem).
    r = jax.lax.broadcasted_iota(jnp.int32, (1, M), 1).astype(f32)
    j = r - Wo * jnp.floor(r / Wo)
    mask_l = (j > 0.5).astype(f32)           # left  neighbour valid (j > 0)
    mask_r = (j < Wo - 1.5).astype(f32)      # right neighbour valid (j < Wo-1)

    PAD = Wo + 1

    def tap_slab(src):
        # src: (Cs, M) f32  ->  (9*Cs, M) slab of shifted/masked taps, ordered
        # dj-major so each horizontal mask hits one contiguous 3*Cs-row group.
        # Vertical zero-padding falls out of the zero halo; horizontal wrap is
        # removed by mask_l / mask_r (applied once per group).
        zeros = jnp.zeros((src.shape[0], PAD), f32)
        padded = jnp.concatenate([zeros, src, zeros], axis=1)  # (Cs, M + 2*PAD)
        groups = []
        for dj, mask in ((-1, mask_l), (0, None), (1, mask_r)):
            taps = [padded[:, PAD + di * Wo + dj: PAD + di * Wo + dj + M]
                    for di in (-1, 0, 1)]
            g = jnp.concatenate(taps, axis=0)                  # (3*Cs, M)
            groups.append(g if mask is None else g * mask)
        return jnp.concatenate(groups, axis=0).astype(dot_dtype)

    # ---- relu(thinker(paramdown) + down): one wide dot, f32 residual --------
    t = jnp.maximum(
        jnp.dot(wt_ref[...], tap_slab(h2), preferred_element_type=f32)
        + bt_ref[...] + downT, 0.0)                            # (C, M) f32

    # ---- fattener(...): one wide dot; (Cout, M) store is lane-dense ---------
    y = jnp.dot(wf_ref[...], tap_slab(t), preferred_element_type=f32) + bf_ref[...]
    o_ref[0] = y.astype(o_ref.dtype)


# --------------------------------------------------------------------------- #
# Wrapper: layout plumbing + matmul-ready weight packing (1x traffic), then
# a single pallas_call gridded over the batch.
# --------------------------------------------------------------------------- #
def exp_down_block_forward(x_nchw, params, *, matmul_dtype=jnp.bfloat16):
    n, c, h, w = x_nchw.shape
    assert h % 4 == 0 and w % 4 == 0, "ExpDownBlock requires H, W divisible by 4"
    cout = params["fattener_w"].shape[0]
    ho, wo = h // 4, w // 4
    m = ho * wo
    f32 = jnp.float32

    # Input: NCHW -> transposed space-to-depth (N, 16*C, Ho*Wo).
    # Row index = (p*4 + q)*C + c  (intra-superblock position (p, q)),
    # lane index = i*Wo + j (pooled pixel) -> the big spatial axis is lane-dense.
    xt = x_nchw.astype(f32).reshape(n, c, ho, 4, wo, 4)
    xt = jnp.transpose(xt, (0, 3, 5, 1, 2, 4)).reshape(n, 16 * c, m)
    xt = xt.astype(matmul_dtype)

    # ---- weight packing (numpy; params are concrete) -------------------------
    w1 = np.asarray(params["down1_w"], np.float32)    # (C, C, 2, 2) OIHW
    w2 = np.asarray(params["down2_w"], np.float32)
    wt = np.asarray(params["thinker_w"], np.float32)
    wf = np.asarray(params["fattener_w"], np.float32)

    # avg-pool as a (C, 16C) matrix.
    pool_t = np.tile(np.eye(c, dtype=np.float32), (1, 16)) / 16.0

    # down1: all 4 output sub-positions (a,b) packed into one (4C, 16C) matrix;
    # tap (kh,kw) of sub-position (a,b) hits superblock slot (p,q)=(2a+kh,2b+kw).
    w1_t = np.zeros((4 * c, 16 * c), np.float32)
    for a in range(2):
        for b in range(2):
            ab = a * 2 + b
            for kh in range(2):
                for kw in range(2):
                    p, q = 2 * a + kh, 2 * b + kw
                    w1_t[ab * c:(ab + 1) * c,
                         (p * 4 + q) * c:(p * 4 + q + 1) * c] = w1[:, :, kh, kw]

    # down2 consumes the 4 sub-positions: (C, 4C).
    w2_t = w2.transpose(0, 2, 3, 1).reshape(c, 4 * c)
    # 3x3 convs: (Cout, 9C) with taps in dj-major (kw-major) order to match
    # the kernel's slab ordering.
    wt_t = wt.transpose(0, 3, 2, 1).reshape(c, 9 * c)
    wf_t = wf.transpose(0, 3, 2, 1).reshape(cout, 9 * c)

    b1_t = np.tile(np.asarray(params["down1_b"], np.float32), 4).reshape(4 * c, 1)
    b2_t = np.asarray(params["down2_b"], np.float32).reshape(c, 1)
    bt_t = np.asarray(params["thinker_b"], np.float32).reshape(c, 1)
    bf_t = np.asarray(params["fattener_b"], np.float32).reshape(cout, 1)

    wd = lambda a: jnp.asarray(a, matmul_dtype)   # matmul operands (bf16 default)
    bd = lambda a: jnp.asarray(a, f32)            # biases stay f32

    kernel = functools.partial(_fused_kernel, M=m, Wo=wo, dot_dtype=matmul_dtype)

    def whole(shape):
        return pl.BlockSpec(shape, lambda i: (0,) * len(shape))

    flops = 2 * n * m * (c * 16 * c + 4 * c * 16 * c + c * 4 * c
                         + c * 9 * c + cout * 9 * c)
    w_bytes = ((pool_t.size + w1_t.size + w2_t.size + wt_t.size + wf_t.size)
               * jnp.dtype(matmul_dtype).itemsize
               + (b1_t.size + b2_t.size + bt_t.size + bf_t.size) * 4)
    bytes_accessed = int(xt.size * xt.dtype.itemsize + w_bytes + n * m * cout * 4)

    # Per-generation VMEM budget (v7x has 64 MiB physical, v6e/v5e 128 MiB).
    try:
        vmem_cap = pltpu.get_tpu_info().vmem_capacity_bytes
    except Exception:
        vmem_cap = 64 * 1024 * 1024
    vmem_limit = min(int(vmem_cap * 3 // 4), 100 * 1024 * 1024)

    out = pl.pallas_call(
        kernel,
        out_shape=jax.ShapeDtypeStruct((n, cout, m), f32),
        grid=(n,),
        in_specs=[
            pl.BlockSpec((1, 16 * c, m), lambda i: (i, 0, 0)),  # x tile (per image)
            whole((c, 16 * c)),                                  # avg-pool matrix
            whole((4 * c, 16 * c)), whole((4 * c, 1)),           # down1
            whole((c, 4 * c)), whole((c, 1)),                    # down2
            whole((c, 9 * c)), whole((c, 1)),                    # thinker
            whole((cout, 9 * c)), whole((cout, 1)),              # fattener
        ],
        out_specs=pl.BlockSpec((1, cout, m), lambda i: (i, 0, 0)),
        compiler_params=pltpu.CompilerParams(
            dimension_semantics=("parallel",),
            vmem_limit_bytes=vmem_limit),
        cost_estimate=pl.CostEstimate(flops=flops, transcendentals=0,
                                      bytes_accessed=bytes_accessed),
    )(xt, wd(pool_t), wd(w1_t), bd(b1_t), wd(w2_t), bd(b2_t),
      wd(wt_t), bd(bt_t), wd(wf_t), bd(bf_t))

    return out.reshape(n, cout, ho, wo)                          # already NCHW


# --------------------------------------------------------------------------- #
# Pure-JAX reference (for the correctness check)
# --------------------------------------------------------------------------- #
def _ref_conv(x_nchw, w, b, stride, pad):
    y = jax.lax.conv_general_dilated(
        x_nchw, w, (stride, stride), [(pad, pad), (pad, pad)],
        dimension_numbers=("NCHW", "OIHW", "NCHW"))
    return y + b.reshape(1, -1, 1, 1)


def _ref_forward(x, p):
    n, c, hh, ww = x.shape
    relu = lambda v: jnp.maximum(v, 0.0)
    down = jnp.mean(x.reshape(n, c, hh // 4, 4, ww // 4, 4), axis=(3, 5))
    h = relu(_ref_conv(x, p["down1_w"], p["down1_b"], 2, 0))
    h = relu(_ref_conv(h, p["down2_w"], p["down2_b"], 2, 0))
    t = relu(_ref_conv(h, p["thinker_w"], p["thinker_b"], 1, 1) + down)
    return _ref_conv(t, p["fattener_w"], p["fattener_b"], 1, 1)


# --------------------------------------------------------------------------- #
if __name__ == "__main__":
    in_channels, out_channels = 4, 8
    batch, spatial = 2, 16

    key = jax.random.PRNGKey(0)
    keys = jax.random.split(key, 9)

    def w_init(k, shape):
        return jax.random.normal(k, shape, dtype=jnp.float32) * 0.1

    params = {
        "down1_w": w_init(keys[0], (in_channels, in_channels, 2, 2)),
        "down1_b": w_init(keys[1], (in_channels,)),
        "down2_w": w_init(keys[2], (in_channels, in_channels, 2, 2)),
        "down2_b": w_init(keys[3], (in_channels,)),
        "thinker_w": w_init(keys[4], (in_channels, in_channels, 3, 3)),
        "thinker_b": w_init(keys[5], (in_channels,)),
        "fattener_w": w_init(keys[6], (out_channels, in_channels, 3, 3)),
        "fattener_b": w_init(keys[7], (out_channels,)),
    }

    x = jax.random.normal(keys[8], (batch, in_channels, spatial, spatial),
                          dtype=jnp.float32)

    ref = jax.block_until_ready(_ref_forward(x, params))

    # Strict check with f32 matmul operands (same math as the reference).
    out_f32 = jax.block_until_ready(
        exp_down_block_forward(x, params, matmul_dtype=jnp.float32))
    assert out_f32.shape == (batch, out_channels, spatial // 4, spatial // 4)
    np.testing.assert_allclose(np.asarray(out_f32), np.asarray(ref),
                               rtol=1e-3, atol=1e-3)

    # Default perf path: bf16 matmul operands, f32 accumulate / elementwise.
    out_bf16 = jax.block_until_ready(exp_down_block_forward(x, params))
    assert out_bf16.shape == (batch, out_channels, spatial // 4, spatial // 4)
    np.testing.assert_allclose(np.asarray(out_bf16), np.asarray(ref),
                               rtol=2e-2, atol=2e-2)

    print("KERNEL_OK")
</pallas_src>

<mosaic_0001>
module attributes {stable_mosaic.version = 11 : i64} {
  func.func @_fused_kernel(%arg0: i32, %arg1: memref<1x64x16xf32, #tpu.memory_space<vmem>>, %arg2: memref<4x64xf32, #tpu.memory_space<vmem>>, %arg3: memref<16x64xf32, #tpu.memory_space<vmem>>, %arg4: memref<16x1xf32, #tpu.memory_space<vmem>>, %arg5: memref<4x16xf32, #tpu.memory_space<vmem>>, %arg6: memref<4x1xf32, #tpu.memory_space<vmem>>, %arg7: memref<4x36xf32, #tpu.memory_space<vmem>>, %arg8: memref<4x1xf32, #tpu.memory_space<vmem>>, %arg9: memref<8x36xf32, #tpu.memory_space<vmem>>, %arg10: memref<8x1xf32, #tpu.memory_space<vmem>>, %arg11: memref<1x8x16xf32, #tpu.memory_space<vmem>>) attributes {dimension_semantics = [#tpu.dimension_semantics<parallel>], iteration_bounds = array<i64: 2>, scalar_prefetch = 0 : i64, scratch_operands = 0 : i64, tpu.core_type = #tpu.core_type<tc>, window_params = [{transform_indices = @transform_0, window_bounds = array<i64: 1, 64, 16>}, {pipeline_mode = #tpu.pipeline_mode<synchronous>, transform_indices = @transform_1, window_bounds = array<i64: 4, 64>}, {pipeline_mode = #tpu.pipeline_mode<synchronous>, transform_indices = @transform_2, window_bounds = array<i64: 16, 64>}, {pipeline_mode = #tpu.pipeline_mode<synchronous>, transform_indices = @transform_3, window_bounds = array<i64: 16, 1>}, {pipeline_mode = #tpu.pipeline_mode<synchronous>, transform_indices = @transform_4, window_bounds = array<i64: 4, 16>}, {pipeline_mode = #tpu.pipeline_mode<synchronous>, transform_indices = @transform_5, window_bounds = array<i64: 4, 1>}, {pipeline_mode = #tpu.pipeline_mode<synchronous>, transform_indices = @transform_6, window_bounds = array<i64: 4, 36>}, {pipeline_mode = #tpu.pipeline_mode<synchronous>, transform_indices = @transform_7, window_bounds = array<i64: 4, 1>}, {pipeline_mode = #tpu.pipeline_mode<synchronous>, transform_indices = @transform_8, window_bounds = array<i64: 8, 36>}, {pipeline_mode = #tpu.pipeline_mode<synchronous>, transform_indices = @transform_9, window_bounds = array<i64: 8, 1>}, {transform_indices = @transform_10, window_bounds = array<i64: 1, 8, 16>}]} {
    %c0 = arith.constant 0 : index
    %c0_0 = arith.constant 0 : index
    %c0_1 = arith.constant 0 : index
    %0 = vector.load %arg1[%c0, %c0_0, %c0_1] : memref<1x64x16xf32, #tpu.memory_space<vmem>>, vector<1x64x16xf32>
    %1 = vector.shape_cast %0 : vector<1x64x16xf32> to vector<64x16xf32>
    %c0_2 = arith.constant 0 : index
    %c0_3 = arith.constant 0 : index
    %2 = vector.load %arg2[%c0_2, %c0_3] : memref<4x64xf32, #tpu.memory_space<vmem>>, vector<4x64xf32>
    %cst = arith.constant dense<0.000000e+00> : vector<4x16xf32>
    %3 = tpu.matmul %2, %1, %cst {dimension_numbers = #tpu.dot_dimension_numbers<[1], [0], [0], [1], [0, 0, 1, 1], [], []>} : vector<4x64xf32>, vector<64x16xf32>, vector<4x16xf32> -> vector<4x16xf32>
    %c0_4 = arith.constant 0 : index
    %c0_5 = arith.constant 0 : index
    %4 = vector.load %arg3[%c0_4, %c0_5] : memref<16x64xf32, #tpu.memory_space<vmem>>, vector<16x64xf32>
    %cst_6 = arith.constant dense<0.000000e+00> : vector<16x16xf32>
    %5 = tpu.matmul %4, %1, %cst_6 {dimension_numbers = #tpu.dot_dimension_numbers<[1], [0], [0], [1], [0, 0, 1, 1], [], []>} : vector<16x64xf32>, vector<64x16xf32>, vector<16x16xf32> -> vector<16x16xf32>
    %c0_7 = arith.constant 0 : index
    %c0_8 = arith.constant 0 : index
    %6 = vector.load %arg4[%c0_7, %c0_8] : memref<16x1xf32, #tpu.memory_space<vmem>>, vector<16x1xf32>
    %7 = vector.broadcast %6 : vector<16x1xf32> to vector<16x16xf32>
    %8 = arith.addf %5, %7 : vector<16x16xf32>
    %cst_9 = arith.constant 0.000000e+00 : f32
    %9 = vector.broadcast %cst_9 : f32 to vector<16x16xf32>
    %10 = arith.maximumf %8, %9 : vector<16x16xf32>
    %c0_10 = arith.constant 0 : index
    %c0_11 = arith.constant 0 : index
    %11 = vector.load %arg5[%c0_10, %c0_11] : memref<4x16xf32, #tpu.memory_space<vmem>>, vector<4x16xf32>
    %cst_12 = arith.constant dense<0.000000e+00> : vector<4x16xf32>
    %12 = tpu.matmul %11, %10, %cst_12 {dimension_numbers = #tpu.dot_dimension_numbers<[1], [0], [0], [1], [0, 0, 1, 1], [], []>} : vector<4x16xf32>, vector<16x16xf32>, vector<4x16xf32> -> vector<4x16xf32>
    %c0_13 = arith.constant 0 : index
    %c0_14 = arith.constant 0 : index
    %13 = vector.load %arg6[%c0_13, %c0_14] : memref<4x1xf32, #tpu.memory_space<vmem>>, vector<4x1xf32>
    %14 = vector.broadcast %13 : vector<4x1xf32> to vector<4x16xf32>
    %15 = arith.addf %12, %14 : vector<4x16xf32>
    %cst_15 = arith.constant 0.000000e+00 : f32
    %16 = vector.broadcast %cst_15 : f32 to vector<4x16xf32>
    %17 = arith.maximumf %15, %16 : vector<4x16xf32>
    %18 = tpu.iota {dimensions = array<i32: 1>} : vector<1x16xi32>
    %19 = arith.sitofp %18 : vector<1x16xi32> to vector<1x16xf32>
    %cst_16 = arith.constant 4.000000e+00 : f32
    %20 = vector.broadcast %cst_16 : f32 to vector<1x16xf32>
    %21 = arith.divf %19, %20 : vector<1x16xf32>
    %22 = math.floor %21 : vector<1x16xf32>
    %cst_17 = arith.constant 4.000000e+00 : f32
    %23 = vector.broadcast %cst_17 : f32 to vector<1x16xf32>
    %24 = arith.mulf %23, %22 : vector<1x16xf32>
    %25 = arith.subf %19, %24 : vector<1x16xf32>
    %cst_18 = arith.constant 5.000000e-01 : f32
    %26 = vector.broadcast %cst_18 : f32 to vector<1x16xf32>
    %27 = arith.cmpf ogt, %25, %26 : vector<1x16xf32>
    %28 = arith.extui %27 : vector<1x16xi1> to vector<1x16xi32>
    %29 = arith.sitofp %28 : vector<1x16xi32> to vector<1x16xf32>
    %cst_19 = arith.constant 2.500000e+00 : f32
    %30 = vector.broadcast %cst_19 : f32 to vector<1x16xf32>
    %31 = arith.cmpf olt, %25, %30 : vector<1x16xf32>
    %32 = arith.extui %31 : vector<1x16xi1> to vector<1x16xi32>
    %33 = arith.sitofp %32 : vector<1x16xi32> to vector<1x16xf32>
    %c0_20 = arith.constant 0 : index
    %c0_21 = arith.constant 0 : index
    %34 = vector.load %arg7[%c0_20, %c0_21] : memref<4x36xf32, #tpu.memory_space<vmem>>, vector<4x36xf32>
    %cst_22 = arith.constant 0.000000e+00 : f32
    %35 = vector.broadcast %cst_22 : f32 to vector<4x5xf32>
    %36 = tpu.concatenate %35, %17, %35 in 1 : vector<4x5xf32>, vector<4x16xf32>, vector<4x5xf32> -> vector<4x26xf32>
    %37 = vector.extract_strided_slice %36 {offsets = [0, 0], sizes = [4, 16], strides = [1, 1]} : vector<4x26xf32> to vector<4x16xf32>
    %38 = vector.extract_strided_slice %36 {offsets = [0, 4], sizes = [4, 16], strides = [1, 1]} : vector<4x26xf32> to vector<4x16xf32>
    %39 = vector.extract_strided_slice %36 {offsets = [0, 8], sizes = [4, 16], strides = [1, 1]} : vector<4x26xf32> to vector<4x16xf32>
    %40 = tpu.concatenate %37, %38, %39 in 0 : vector<4x16xf32>, vector<4x16xf32>, vector<4x16xf32> -> vector<12x16xf32>
    %41 = vector.broadcast %29 : vector<1x16xf32> to vector<12x16xf32>
    %42 = arith.mulf %40, %41 : vector<12x16xf32>
    %43 = vector.extract_strided_slice %36 {offsets = [0, 1], sizes = [4, 16], strides = [1, 1]} : vector<4x26xf32> to vector<4x16xf32>
    %44 = vector.extract_strided_slice %36 {offsets = [0, 5], sizes = [4, 16], strides = [1, 1]} : vector<4x26xf32> to vector<4x16xf32>
    %45 = vector.extract_strided_slice %36 {offsets = [0, 9], sizes = [4, 16], strides = [1, 1]} : vector<4x26xf32> to vector<4x16xf32>
    %46 = tpu.concatenate %43, %44, %45 in 0 : vector<4x16xf32>, vector<4x16xf32>, vector<4x16xf32> -> vector<12x16xf32>
    %47 = vector.extract_strided_slice %36 {offsets = [0, 2], sizes = [4, 16], strides = [1, 1]} : vector<4x26xf32> to vector<4x16xf32>
    %48 = vector.extract_strided_slice %36 {offsets = [0, 6], sizes = [4, 16], strides = [1, 1]} : vector<4x26xf32> to vector<4x16xf32>
    %49 = vector.extract_strided_slice %36 {offsets = [0, 10], sizes = [4, 16], strides = [1, 1]} : vector<4x26xf32> to vector<4x16xf32>
    %50 = tpu.concatenate %47, %48, %49 in 0 : vector<4x16xf32>, vector<4x16xf32>, vector<4x16xf32> -> vector<12x16xf32>
    %51 = vector.broadcast %33 : vector<1x16xf32> to vector<12x16xf32>
    %52 = arith.mulf %50, %51 : vector<12x16xf32>
    %53 = tpu.concatenate %42, %46, %52 in 0 : vector<12x16xf32>, vector<12x16xf32>, vector<12x16xf32> -> vector<36x16xf32>
    %cst_23 = arith.constant dense<0.000000e+00> : vector<4x16xf32>
    %54 = tpu.matmul %34, %53, %cst_23 {dimension_numbers = #tpu.dot_dimension_numbers<[1], [0], [0], [1], [0, 0, 1, 1], [], []>} : vector<4x36xf32>, vector<36x16xf32>, vector<4x16xf32> -> vector<4x16xf32>
    %c0_24 = arith.constant 0 : index
    %c0_25 = arith.constant 0 : index
    %55 = vector.load %arg8[%c0_24, %c0_25] : memref<4x1xf32, #tpu.memory_space<vmem>>, vector<4x1xf32>
    %56 = vector.broadcast %55 : vector<4x1xf32> to vector<4x16xf32>
    %57 = arith.addf %54, %56 : vector<4x16xf32>
    %58 = arith.addf %57, %3 : vector<4x16xf32>
    %cst_26 = arith.constant 0.000000e+00 : f32
    %59 = vector.broadcast %cst_26 : f32 to vector<4x16xf32>
    %60 = arith.maximumf %58, %59 : vector<4x16xf32>
    %c0_27 = arith.constant 0 : index
    %c0_28 = arith.constant 0 : index
    %61 = vector.load %arg9[%c0_27, %c0_28] : memref<8x36xf32, #tpu.memory_space<vmem>>, vector<8x36xf32>
    %cst_29 = arith.constant 0.000000e+00 : f32
    %62 = vector.broadcast %cst_29 : f32 to vector<4x5xf32>
    %63 = tpu.concatenate %62, %60, %62 in 1 : vector<4x5xf32>, vector<4x16xf32>, vector<4x5xf32> -> vector<4x26xf32>
    %64 = vector.extract_strided_slice %63 {offsets = [0, 0], sizes = [4, 16], strides = [1, 1]} : vector<4x26xf32> to vector<4x16xf32>
    %65 = vector.extract_strided_slice %63 {offsets = [0, 4], sizes = [4, 16], strides = [1, 1]} : vector<4x26xf32> to vector<4x16xf32>
    %66 = vector.extract_strided_slice %63 {offsets = [0, 8], sizes = [4, 16], strides = [1, 1]} : vector<4x26xf32> to vector<4x16xf32>
    %67 = tpu.concatenate %64, %65, %66 in 0 : vector<4x16xf32>, vector<4x16xf32>, vector<4x16xf32> -> vector<12x16xf32>
    %68 = vector.broadcast %29 : vector<1x16xf32> to vector<12x16xf32>
    %69 = arith.mulf %67, %68 : vector<12x16xf32>
    %70 = vector.extract_strided_slice %63 {offsets = [0, 1], sizes = [4, 16], strides = [1, 1]} : vector<4x26xf32> to vector<4x16xf32>
    %71 = vector.extract_strided_slice %63 {offsets = [0, 5], sizes = [4, 16], strides = [1, 1]} : vector<4x26xf32> to vector<4x16xf32>
    %72 = vector.extract_strided_slice %63 {offsets = [0, 9], sizes = [4, 16], strides = [1, 1]} : vector<4x26xf32> to vector<4x16xf32>
    %73 = tpu.concatenate %70, %71, %72 in 0 : vector<4x16xf32>, vector<4x16xf32>, vector<4x16xf32> -> vector<12x16xf32>
    %74 = vector.extract_strided_slice %63 {offsets = [0, 2], sizes = [4, 16], strides = [1, 1]} : vector<4x26xf32> to vector<4x16xf32>
    %75 = vector.extract_strided_slice %63 {offsets = [0, 6], sizes = [4, 16], strides = [1, 1]} : vector<4x26xf32> to vector<4x16xf32>
    %76 = vector.extract_strided_slice %63 {offsets = [0, 10], sizes = [4, 16], strides = [1, 1]} : vector<4x26xf32> to vector<4x16xf32>
    %77 = tpu.concatenate %74, %75, %76 in 0 : vector<4x16xf32>, vector<4x16xf32>, vector<4x16xf32> -> vector<12x16xf32>
    %78 = vector.broadcast %33 : vector<1x16xf32> to vector<12x16xf32>
    %79 = arith.mulf %77, %78 : vector<12x16xf32>
    %80 = tpu.concatenate %69, %73, %79 in 0 : vector<12x16xf32>, vector<12x16xf32>, vector<12x16xf32> -> vector<36x16xf32>
    %cst_30 = arith.constant dense<0.000000e+00> : vector<8x16xf32>
    %81 = tpu.matmul %61, %80, %cst_30 {dimension_numbers = #tpu.dot_dimension_numbers<[1], [0], [0], [1], [0, 0, 1, 1], [], []>} : vector<8x36xf32>, vector<36x16xf32>, vector<8x16xf32> -> vector<8x16xf32>
    %c0_31 = arith.constant 0 : index
    %c0_32 = arith.constant 0 : index
    %82 = vector.load %arg10[%c0_31, %c0_32] : memref<8x1xf32, #tpu.memory_space<vmem>>, vector<8x1xf32>
    %83 = vector.broadcast %82 : vector<8x1xf32> to vector<8x16xf32>
    %84 = arith.addf %81, %83 : vector<8x16xf32>
    %c0_33 = arith.constant 0 : index
    %c0_34 = arith.constant 0 : index
    %c0_35 = arith.constant 0 : index
    %85 = vector.load %arg11[%c0_33, %c0_34, %c0_35] : memref<1x8x16xf32, #tpu.memory_space<vmem>>, vector<1x8x16xf32>
    %86 = vector.shape_cast %85 : vector<1x8x16xf32> to vector<8x16xf32>
    %87 = vector.shape_cast %84 : vector<8x16xf32> to vector<1x8x16xf32>
    tpu.vector_store %arg11[%c0_33, %c0_34, %c0_35], %87 {strides = array<i32>} : memref<1x8x16xf32, #tpu.memory_space<vmem>>, vector<1x8x16xf32>,
    return
  }
  func.func @transform_0(%arg0: i32) -> (i32, i32, i32) {
    %c0_i32 = arith.constant 0 : i32
    %c0_i32_0 = arith.constant 0 : i32
    %c0_i32_1 = arith.constant 0 : i32
    return %arg0, %c0_i32, %c0_i32_0 : i32, i32, i32
  }
  func.func @transform_1(%arg0: i32) -> (i32, i32) {
    %c0_i32 = arith.constant 0 : i32
    %c0_i32_0 = arith.constant 0 : i32
    %c0_i32_1 = arith.constant 0 : i32
    return %c0_i32, %c0_i32_0 : i32, i32
  }
  func.func @transform_2(%arg0: i32) -> (i32, i32) {
    %c0_i32 = arith.constant 0 : i32
    %c0_i32_0 = arith.constant 0 : i32
    %c0_i32_1 = arith.constant 0 : i32
    return %c0_i32, %c0_i32_0 : i32, i32
  }
  func.func @transform_3(%arg0: i32) -> (i32, i32) {
    %c0_i32 = arith.constant 0 : i32
    %c0_i32_0 = arith.constant 0 : i32
    %c0_i32_1 = arith.constant 0 : i32
    return %c0_i32, %c0_i32_0 : i32, i32
  }
  func.func @transform_4(%arg0: i32) -> (i32, i32) {
    %c0_i32 = arith.constant 0 : i32
    %c0_i32_0 = arith.constant 0 : i32
    %c0_i32_1 = arith.constant 0 : i32
    return %c0_i32, %c0_i32_0 : i32, i32
  }
  func.func @transform_5(%arg0: i32) -> (i32, i32) {
    %c0_i32 = arith.constant 0 : i32
    %c0_i32_0 = arith.constant 0 : i32
    %c0_i32_1 = arith.constant 0 : i32
    return %c0_i32, %c0_i32_0 : i32, i32
  }
  func.func @transform_6(%arg0: i32) -> (i32, i32) {
    %c0_i32 = arith.constant 0 : i32
    %c0_i32_0 = arith.constant 0 : i32
    %c0_i32_1 = arith.constant 0 : i32
    return %c0_i32, %c0_i32_0 : i32, i32
  }
  func.func @transform_7(%arg0: i32) -> (i32, i32) {
    %c0_i32 = arith.constant 0 : i32
    %c0_i32_0 = arith.constant 0 : i32
    %c0_i32_1 = arith.constant 0 : i32
    return %c0_i32, %c0_i32_0 : i32, i32
  }
  func.func @transform_8(%arg0: i32) -> (i32, i32) {
    %c0_i32 = arith.constant 0 : i32
    %c0_i32_0 = arith.constant 0 : i32
    %c0_i32_1 = arith.constant 0 : i32
    return %c0_i32, %c0_i32_0 : i32, i32
  }
  func.func @transform_9(%arg0: i32) -> (i32, i32) {
    %c0_i32 = arith.constant 0 : i32
    %c0_i32_0 = arith.constant 0 : i32
    %c0_i32_1 = arith.constant 0 : i32
    return %c0_i32, %c0_i32_0 : i32, i32
  }
  func.func @transform_10(%arg0: i32) -> (i32, i32, i32) {
    %c0_i32 = arith.constant 0 : i32
    %c0_i32_0 = arith.constant 0 : i32
    %c0_i32_1 = arith.constant 0 : i32
    return %arg0, %c0_i32, %c0_i32_0 : i32, i32, i32
  }
}

</mosaic_0001>

<bundles_post_ra>
// kernel: tpu_custom_call.1
= control target key start
LH: loop header
LB: loop body
LE: loop exit
PB: predicated region body
PF: predicated region fallthrough
CT: control target
= control target key end

     0   :  { %s1080_s0 = inlined_call_operand.vmem [shape: f32[2,64,16], index: 0, kind: input, shape index: {}]   ;;  %s1081_s1 = inlined_call_operand.vmem [shape: f32[4,64], index: 1, kind: input, shape index: {}]   ;;  %s1082_s2 = inlined_call_operand.vmem [shape: f32[16,64], index: 2, kind: input, shape index: {}]   ;;  %s1083_s3 = inlined_call_operand.vmem [shape: f32[16,1], index: 3, kind: input, shape index: {}]   ;;  %s1084_s4 = inlined_call_operand.vmem [shape: f32[4,16], index: 4, kind: input, shape index: {}]   ;;  %s1085_s5 = inlined_call_operand.vmem [shape: f32[4,1], index: 5, kind: input, shape index: {}]   ;;  %s1086_s6 = inlined_call_operand.vmem [shape: f32[4,36], index: 6, kind: input, shape index: {}]   ;;  %s1087_s7 = inlined_call_operand.vmem [shape: f32[4,1], index: 7, kind: input, shape index: {}]   ;;  %s1088_s8 = inlined_call_operand.vmem [shape: f32[8,36], index: 8, kind: input, shape index: {}]   ;;  %s1089_s9 = inlined_call_operand.vmem [shape: f32[8,1], index: 9, kind: input, shape index: {}]   ;;  %s1090_s10 = inlined_call_operand.hbm [shape: f32[2,8,16], index: 10, kind: output, shape index: {}]  }
   0x1   :  { %1091 = sst [smem:[#allocation5_spill]] %s1080_s0 }
   0x2   :  { %15 = vsyncpa [#allocation3], 0 }
   0x3   :  { %17 = vsyncpa [#allocation3 + $0x1], 0  ;;  %s925_s13 = smov 0   ;;  %s927_s14 = smov 0  }
   0x4   :  { %s929_s15 = smov 0   ;;  %s931_s16 = smov 0  }
   0x5 LB: > { %s946_s17 = sadd.s32 4294967295, %s859_s16   ;;  %s712_s18 = sadd.s32 4294967294, %s859_s16   ;;  %s859_s16 = sphi %s931_s16, %s1098_s16   ;;  %s855_s15 = sphi %s929_s15, %s1097_s15   ;;  %s851_s14 = sphi %s927_s14, %s1096_s14   ;;  %s847_s13 = sphi %s925_s13, %s1095_s13  }
   0x6   : > { %s950_s19 = sadd.s32 1, %s859_s16   ;;  %s245_s20 = sadd.s32 1, %s855_s15 }
   0x7   : > { %s242_s21 = ssub.s32 %s859_s16, %s950_s19  ;;  %p255_p0 = scmp.ne.s32.totalorder %s855_s15, %s851_s14 }
   0x8   : > { %p243_p1 = scmp.eq.s32.totalorder %s242_s21, 0  ;;  %p256_p2 = scmp.eq.s32.totalorder %s946_s17, 1 }
   0x9   : > { %p261_p3 = scmp.ne.s32.totalorder %s851_s14, %s847_s13  ;;  %p262_p4 = scmp.eq.s32.totalorder %s712_s18, 1 }
   0xa   : > { %s961_s22 = scalar_select %p243_p1, %s855_s15, %s245_s20  }
   0xb   : > { %p963_p5 = por %p256_p2, %p255_p0  ;;  %p967_p6 = por %p262_p4, %p261_p3 }
   0xc   : > { %p715_p7 = scmp.ge.s32.totalorder %s859_s16, 1  ;;  %p315_p8 = scmp.lt.s32.totalorder %s859_s16, 3 }
   0xe   : > { %p316_p9 = pnand %p715_p7, %p315_p8 }
   0xf   : > { %p353_p10 = scmp.lt.s32.totalorder (!%p316_p9), %s946_s17, 1  ;;  %s1094_s0 = sld [smem:[#allocation5_spill]] (!%p316_p9) }
  0x10   : > { %319 = sbr.rel (%p316_p9) target bundleno = 1293 (0x50d), region = 60  ;;  %s865_s12 = smov (!%p316_p9), 120  }
  0x11   : > { %s866_s18 = smov (!%p316_p9), 124   ;;  %s867_s20 = smov (!%p316_p9), 2  }
  0x12   : > { %s868_s21 = smov (!%p316_p9), 126   ;;  %s350_s25 = sand.u32 (!%p316_p9), 1, %s851_s14  }
  0x13   : > { %s716_s26 = sshll.u32 (!%p316_p9), %s350_s25, 3 }
  0x15   : > { %v394_v0 = vld [vmem:[%s1083_s3 + $0x8] sm:$0xff]  ;;  %v861_v1 = vmov 0   ;;  %s354_s27 = scalar_select %p353_p10, %s946_s17, 1  ;;  %v393_v4 = vld [vmem:[%s1083_s3] sm:$0xff]  ;;  %vm367_vm0 = vcmask 523264   ;;  %vm443_vm1 = vcmask 130048   ;;  %v468_v31 = vlaneseq }
  0x16   : > { %782 = vset.pattern.permute.xlu0 %v861_v1  ;;  %783 = vset.pattern.permute.xlu1 %v861_v1  ;;  %v391_v11 = vld [vmem:[%s1082_s2] sm:$0xff]  ;;  %v392_v12 = vld [vmem:[%s1082_s2 + $0x8] sm:$0xff]  ;;  %v863_v27 = vmov 4.0   ;;  %v864_v41 = vmov 0.0   ;;  %vm493_vm4 = vcmask 39936   ;;  %vm495_vm5 = vcmask 171008  }
  0x17   : > { %402 = vperm.xlu0 %782, %v394_v0   ;;  %794 = vset.pattern.permute.xlu2 %v861_v1  ;;  %s733_s28 = sshll.u32 %s354_s27, 6  ;;  %v437_v13 = vld [vmem:[%s1085_s5] sm:$0xf]  ;;  %795 = vrcp.f32 %v863_v27  ;;  %v469_v33 = vand.u32 127, %v468_v31  ;;  %vm505_vm7 = vcmask 1043456   ;;  %s869_s27 = smov 127  }
  0x18   : > { %s357_s11 = scalar_lea.vmem %s1094_s0, %s733_s28  ;;  %440 = vperm.xlu1 %783, %v437_v13   ;;  %v436_v22 = vld [vmem:[%s1084_s4] sm:$0xf]  ;;  %vm539_vm8 = vcmask 293888  }
  0x19   : > { %v365_v2 = vld [vmem:[%s357_s11 + $0x38] sm:$0xff]  ;;  %v364_v3 = vld [vmem:[%s357_s11 + $0x30] sm:$0xff]  ;;  %v363_v5 = vld [vmem:[%s357_s11 + $0x28] sm:$0xff]  ;;  %v470_v35 = vcvt.s32.f32 %v469_v33 }
  0x1a   : > { %419 = vmatpush.msra.mxu1 %v365_v2  ;;  %379 = vmatpush.msra.mxu0 %v365_v2  ;;  %v362_v6 = vld [vmem:[%s357_s11 + $0x20] sm:$0xff]  ;;  %v361_v7 = vld [vmem:[%s357_s11 + $0x18] sm:$0xff]  ;;  %v360_v8 = vld [vmem:[%s357_s11 + $0x10] sm:$0xff] }
  0x1b   : > { %v359_v9 = vld [vmem:[%s357_s11 + $0x8] sm:$0xff]  ;;  %v358_v10 = vld [vmem:[%s357_s11] sm:$0xff]  ;;  %s862_s11 = smov 5  }
  0x1c   : > { %420 = vmatpush.msra.mxu1 %v364_v3  ;;  %380 = vmatpush.msra.mxu0 %v364_v3  ;;  %v533_v51 = vld [vmem:[%s1087_s7] sm:$0xf] }
  0x1d   : > { %v796_v28 = vpop.eup %795  ;;  %v366_v59 = vld [vmem:[%s1081_s1] sm:$0xf] }
  0x1e   : > { %421 = vmatpush.msra.mxu1 %v363_v5  ;;  %381 = vmatpush.msra.mxu0 %v363_v5  ;;  %v472_v29 = vmul.f32 4.0, %v796_v28  ;;  %vm476_vm2 = vweird.f32 %v796_v28  ;;  %v567_v33 = vld [vmem:[%s1088_s8] sm:$0xff] }
  0x1f   : > { %397 = vperm.xlu0 %782, %v393_v4   ;;  %v488_v4 = vld [vmem:[%s1086_s6] sm:$0xf] }
  0x20   : > { %422 = vmatpush.msra.mxu1 %v362_v6  ;;  %382 = vmatpush.msra.mxu0 %v362_v6  ;;  %v473_v30 = vsub.f32 1.0, %v472_v29 }
  0x22   : > { %423 = vmatpush.msra.mxu1 %v361_v7  ;;  %383 = vmatpush.msra.mxu0 %v361_v7  ;;  %v474_v32 = vmul.f32 %v796_v28, %v473_v30 }
  0x24   : > { %424 = vmatpush.msra.mxu1 %v360_v8  ;;  %384 = vmatpush.msra.mxu0 %v360_v8  ;;  %v475_v34 = vadd.f32 %v796_v28, %v474_v32 }
  0x26   : > { %425 = vmatpush.msra.mxu1 %v359_v9  ;;  %385 = vmatpush.msra.mxu0 %v359_v9  ;;  %v477_v36 = vsel %vm476_vm2, %v796_v28, %v475_v34 }
  0x27   : > { %v478_v37 = vmul.f32 %v477_v36, %v470_v35 }
  0x28   : > { %426 = vmatpush.msra.mxu1 %v358_v10  ;;  %386 = vmatpush.msra.mxu0 %v358_v10 }
  0x29   : > { %720 = vmatmul.msk.f32.vlgmr.msra.gmra.mxu1 %vm367_vm0, %v391_v11  ;;  %v479_v38 = vfloor.f32 %v478_v37  ;;  %719 = vmatmul.msk.f32.vlgmr.msra.gmra.mxu0 %vm367_vm0, %v366_v59 }
  0x2b   : > { %v480_v39 = vmul.f32 4.0, %v479_v38 }
  0x2d   : > { %v481_v40 = vsub.f32 %v470_v35, %v480_v39 }
  0x2f   : > { %vm482_vm3 = vcmp.gt.f32.partialorder %v481_v40, 0.5  ;;  %vm485_vm6 = vcmp.lt.f32.partialorder %v481_v40, 2.5 }
  0x30   : > { %v1000_v42 = vsel %vm482_vm3, 1.0, %v864_v41  ;;  %v724_v47 = vsel %vm485_vm6, 1.0, %v864_v41 }
  0x31   : > { %721 = vmatmul.msk.f32.gmra.mxu1 %vm367_vm0, %v392_v12 }
  0x89   : > { %v403_v14 = vpop.permute.xlu0 %402 }
  0x8a   : > { %v441_v23 = vpop.permute.xlu1 %440 }
  0x91   : > { %v398_v16 = vpop.permute.xlu0 %397 }
  0xa6   : > { %v428_v15 = vpop.f32.mrf.mxu1  ;;  %v388_v7 = vpop.f32.mrf.mxu0 }
  0xa7   : > { %v429_v18 = vadd.f32 %v428_v15, %v398_v16 }
  0xa9   : > { %v434_v21 = vmax.f32 %v429_v18, 0.0 }
  0xae   : > { %v431_v17 = vpop.f32.mrf.mxu1 }
  0xaf   : > { %v432_v19 = vadd.f32 %v431_v17, %v403_v14 }
  0xb1   : > { %v435_v20 = vmax.f32 %v432_v19, 0.0 }
  0xb3   : > { %461 = vmatpush.msra.mxu2 %v435_v20 }
  0xb5   : > { %462 = vmatpush.msra.mxu2 %v434_v21 }
  0xb6   : > { %722 = vmatmul.msk.f32.vlgmr.msra.gmra.mxu2 %vm443_vm1, %v436_v22 }
 0x139   : > { %v464_v24 = vpop.f32.mrf.mxu2 }
 0x13a   : > { %v465_v25 = vadd.f32 %v464_v24, %v441_v23 }
 0x13c   : > { %v467_v26 = vmax.f32 %v465_v25, 0.0  ;;  %v605_v25 = vld [vmem:[%s1089_s9] sm:$0xff] }
 0x13e   : > { %490 = vrot.lane.b32.xlu1 %v467_v26, %s862_s11 }
 0x1b0   : > { %v491_v43 = vpop.permute.xlu1 %490 }
 0x1b1   : > { %v494_v44 = vsel %vm493_vm4, 0.0, %v491_v43 }
 0x1b2   : > { %v496_v45 = vsel %vm495_vm5, %v494_v44, 0.0 }
 0x1b3   : > { %v498_v46 = vrot.slane %v496_v45, 4  ;;  %502 = vrot.lane.b32.xlu2 %v496_v45, %s865_s12 }
 0x1b5   : > { %499 = vrot.lane.b32.xlu0 %v498_v46, %s866_s18 }
 0x1bb   : > { %510 = vrot.lane.b32.xlu2 %v724_v47, %s867_s20  ;;  %s352_s20 = scalar_lea.vmem [#allocation2], %s716_s26  ;;  %s817_s26 = scalar_lea.hbm %s1090_s10, 16 }
 0x20d   : > { %v503_v48 = vpop.permute.xlu2 %502 }
 0x20e   : > { %v517_v54 = vrot.slane %v503_v48, 4  ;;  %v508_v63 = vmul.f32 %v1000_v42, %v503_v48 }
 0x215   : > { %v511_v49 = vpop.permute.xlu2 %510 }
 0x216   : > { %v514_v50 = vmul.f32 %v511_v49, %v503_v48 }
 0x218   : > { %529 = vrot.lane.b32.xlu1 %v514_v50, %s868_s21 }
 0x220   : > { %536 = vperm.xlu1 %783, %v533_v51  }
 0x227   : > { %v500_v52 = vpop.permute.xlu0 %499 }
 0x228   : > { %v506_v53 = vsel %vm505_vm7, %v496_v45, %v500_v52 }
 0x229   : > { %v516_v55 = vrot.slane %v506_v53, 4  ;;  %v513_v56 = vmul.f32 %v511_v49, %v506_v53  ;;  %v507_v3 = vmul.f32 %v1000_v42, %v506_v53 }
 0x22b   : > { %527 = vrot.lane.b32.xlu2 %v513_v56, %s868_s21  ;;  %v518_v57 = vsel %vm505_vm7, %v516_v55, %v517_v54 }
 0x22c   : > { %v784_v58 = vpack.i.bf16 %v516_v55, %v518_v57 }
 0x22e   : > { %785 = vrot.lane.b32.xlu0 %v784_v58, %s869_s27 }
 0x285   : > { %v528_v61 = vpop.permute.xlu2 %527 }
 0x28a   : > { %v530_v60 = vpop.permute.xlu1 %529 }
 0x28b   : > { %725 = vmatpush.msk.msra.mxu3 %vm505_vm7, %v530_v60 }
 0x28d   : > { %557 = vmatpush.msra.mxu3 %v528_v61 }
 0x292   : > { %v537_v5 = vpop.permute.xlu1 %536 }
 0x2a0   : > { %v786_v62 = vpop.permute.xlu0 %785 }
 0x2a1   : > { %v788_v0 = vunpack.i.h.bf16 %v786_v62  ;;  %v787_v1 = vunpack.i.l.bf16 %v786_v62 }
 0x2a3   : > { %558 = vmatpush.msra.mxu3 %v787_v1  ;;  %v532_v2 = vsel %vm505_vm7, %v508_v63, %v788_v0 }
 0x2a5   : > { %559 = vmatpush.msra.mxu3 %v532_v2 }
 0x2a7   : > { %560 = vmatpush.msra.mxu3 %v507_v3 }
 0x2a8   : > { %726 = vmatmul.msk.f32.vlgmr.msra.gmra.mxu3 %vm539_vm8, %v488_v4 }
 0x32b   : > { %v562_v6 = vpop.f32.mrf.mxu3 }
 0x32c   : > { %v563_v8 = vadd.f32 %v562_v6, %v537_v5 }
 0x32e   : > { %v565_v9 = vadd.f32 %v563_v8, %v388_v7 }
 0x330   : > { %v566_v10 = vmax.f32 %v565_v9, 0.0 }
 0x332   : > { %569 = vrot.lane.b32.xlu2 %v566_v10, %s862_s11  ;;  %s650_s11 = sshll.u32 %s352_s20, 4  ;;  %s651_s11 = int_to_ptr.vmem [resolvable:$true] %s650_s11 }
 0x38c   : > { %v570_v11 = vpop.permute.xlu2 %569 }
 0x38d   : > { %v572_v12 = vsel %vm493_vm4, 0.0, %v570_v11 }
 0x38e   : > { %v573_v13 = vsel %vm495_vm5, %v572_v12, 0.0 }
 0x38f   : > { %v575_v14 = vrot.slane %v573_v13, 4  ;;  %579 = vrot.lane.b32.xlu0 %v573_v13, %s865_s12 }
 0x391   : > { %576 = vrot.lane.b32.xlu1 %v575_v14, %s866_s18  ;;  %s638_s18 = scalar_lea.sflag [#allocation3], %s350_s25 }
 0x401   : > { %v580_v15 = vpop.permute.xlu0 %579 }
 0x402   : > { %v586_v16 = vmul.f32 %v580_v15, %v511_v49  ;;  %v589_v19 = vrot.slane %v580_v15, 4  ;;  %v584_v28 = vmul.f32 %v1000_v42, %v580_v15 }
 0x403   : > { %v577_v17 = vpop.permute.xlu1 %576 }
 0x404   : > { %v582_v18 = vsel %vm505_vm7, %v573_v13, %v577_v17  ;;  %601 = vrot.lane.b32.xlu2 %v586_v16, %s868_s21 }
 0x405   : > { %v588_v20 = vrot.slane %v582_v18, 4  ;;  %v585_v21 = vmul.f32 %v582_v18, %v511_v49  ;;  %v583_v32 = vmul.f32 %v1000_v42, %v582_v18 }
 0x407   : > { %599 = vrot.lane.b32.xlu0 %v585_v21, %s868_s21  ;;  %v590_v22 = vsel %vm505_vm7, %v588_v20, %v589_v19 }
 0x408   : > { %v789_v23 = vpack.i.bf16 %v588_v20, %v590_v22 }
 0x40a   : > { %790 = vrot.lane.b32.xlu1 %v789_v23, %s869_s27  ;;  %s730_s27 = sshll.u32 %s946_s17, 3 }
 0x40b   : > { %s648_s30 = scalar_lea.hbm %s1090_s10, %s730_s27 }
 0x40c   : > { %608 = vperm.xlu2 %794, %v605_v25   ;;  %s652_s12 = sshll.u32 %s648_s30, 4  ;;  %s653_s12 = int_to_ptr.hbm [resolvable:$true] %s652_s12 }
 0x40d   : > { %s811_s21 = sshra.s32 %s653_s12, 4  ;;  %s812_s21 = int_to_ptr.hbm [resolvable:$true] %s811_s21 }
 0x40e   : > { %s813_s0 = scalar_lea.hbm %s812_s21, 8  ;;  %p818_p0 = scmp.lt.s32.totalorder %s812_s21, %s1090_s10 }
 0x40f   : > { %p814_p11 = scmp.ne.s32.totalorder %s812_s21, %s813_s0  ;;  %p819_p1 = scmp.lt.s32.totalorder %s817_s26, %s813_s0 }
 0x411   : > { %p815_p12 = pnand %p814_p11, %p963_p5  ;;  %p820_p2 = por %p819_p1, %p818_p0 }
 0x413   : > { %p816_p13 = pneg %p815_p12 }
 0x415   : > { %p821_p3 = pnand %p820_p2, %p816_p13 }
 0x45e   : > { %v602_v24 = vpop.permute.xlu2 %601 }
 0x45f   : > { %727 = vmatpush.msk.msrb.mxu2 %vm505_vm7, %v602_v24 }
 0x466   : > { %v609_v34 = vpop.permute.xlu2 %608 }
 0x479   : > { %v600_v26 = vpop.permute.xlu0 %599 }
 0x47a   : > { %628 = vmatpush.msrb.mxu2 %v600_v26 }
 0x47c   : > { %v791_v27 = vpop.permute.xlu1 %790 }
 0x47d   : > { %v793_v29 = vunpack.i.h.bf16 %v791_v27  ;;  %v792_v30 = vunpack.i.l.bf16 %v791_v27 }
 0x47f   : > { %629 = vmatpush.msrb.mxu2 %v792_v30  ;;  %v604_v31 = vsel %vm505_vm7, %v584_v28, %v793_v29 }
 0x481   : > { %630 = vmatpush.msrb.mxu2 %v604_v31 }
 0x483   : > { %631 = vmatpush.msrb.mxu2 %v583_v32 }
 0x484   : > { %728 = vmatmul.msk.f32.vlgmr.msrb.gmra.mxu2 %vm539_vm8, %v567_v33 }
 0x507   : > { %v633_v35 = vpop.f32.mrf.mxu2 }
 0x508   : > { %v634_v36 = vadd.f32 %v633_v35, %v609_v34 }
 0x50a   : > { %636 = vst.msk [vmem:[%s352_s20] sm:$0xff] %vm443_vm1, %v634_v36 }
 0x50b   : > { %824 = shalt.err (!%p821_p3)
}
 0x50c   : > { %734 = dma.vmem_to_hbm [thread:$0]  (%p963_p5), %s651_s11, 128, %s653_s12, %s638_s18  }
 0x50d PF: > { %p740_p4 = scmp.ge.s32.totalorder %s859_s16, 2  ;;  %s664_s25 = sand.u32 1, %s847_s13  }
 0x50e   : > { %s665_s30 = scalar_lea.sflag [#allocation3], %s664_s25 }
 0x50f   : > { %p737_p7 = pnand %p740_p4, %p967_p6 }
 0x511   : > { %p738_p8 = pneg %p737_p7 }
 0x513   : > { %842 = dma.done.wait (%p738_p8), %s665_s30, 128  }
 0x514   : > { %844 = vsyncadd (%p738_p8), %s665_s30, 4294967168  ;;  %p20_p9 = scmp.ge.s32.totalorder %s950_s19, 4   ;;  %s1095_s13 = smov %s851_s14 }
 0x515   : > { %s1096_s14 = smov %s855_s15  ;;  %s1097_s15 = smov %s961_s22 }
 0x516   : > { %s1098_s16 = smov %s950_s19  ;;  %22 = sbr.rel (!%p20_p9) target bundleno = 5 (0x5), region = 95 }
 0x51b   :  { %671 = vsyncpa [#allocation3], 1 }
 0x51c   :  { %673 = vsyncpa [#allocation3 + $0x1], 1 }

</bundles_post_ra>
